<compile_context>
chip_gen: v5e
topology: v5e:2x2
jax: 0.10.0
libtpu: 0.0.40
codegen_flags: <defaults>
</compile_context>

<pallas_src>
import jax
import jax.numpy as jnp
from jax import lax
from jax.experimental import pallas as pl
from jax.experimental.pallas import tpu as pltpu

_NEG_BIG = -1e30  # finite "-inf": avoids inf-inf NaN corner cases


def _round_up(x, m):
    return ((x + m - 1) // m) * m


def _make_supcon_kernel(*, inv_temp, scale, n_anchor, n_contrast, tm, tk,
                        pad_exists, use_keys, has_explicit_mask, col_resident):
    """Kernel factory; static config is baked in via closure."""

    def body(frow_ref, fcol_ref, rkey_ref, ckey_ref, mask_ref,
             out_ref, m_ref, l_ref, ps_ref, pc_ref):
        i = pl.program_id(0)          # anchor-row block   (parallel)
        j = pl.program_id(1)          # contrast-col block (reduction axis)
        n_j = pl.num_programs(1)

        @pl.when(j == 0)
        def _init():
            m_ref[...] = jnp.full((tm, 1), _NEG_BIG, dtype=jnp.float32)
            l_ref[...] = jnp.zeros((tm, 1), dtype=jnp.float32)
            ps_ref[...] = jnp.zeros((tm, 1), dtype=jnp.float32)
            pc_ref[...] = jnp.zeros((tm, 1), dtype=jnp.float32)

        # (tm, tk) logits tile: canonical (m,k)x(k,n) MXU contraction, bf16
        # inputs, f32 accumulation.  Contrast features were pre-transposed and
        # pre-blocked in the wrapper, so no in-kernel transpose can be inserted.
        fcol = fcol_ref[j] if col_resident else fcol_ref[0]
        z = jnp.dot(frow_ref[...], fcol,
                    preferred_element_type=jnp.float32) * inv_temp

        # Block specialization predicates: padded columns exist only in the last
        # column block; the self-contrast diagonal only where ranges overlap.
        if pad_exists:
            is_pad_blk = j == n_j - 1
        else:
            is_pad_blk = False
        has_diag = jnp.logical_and(i * tm < (j + 1) * tk,
                                   j * tk < (i + 1) * tm)
        slow = jnp.logical_or(is_pad_blk, has_diag)

        def update(p, pos_f, m_prev, m_new):
            l_ref[...] = l_ref[...] * jnp.exp(m_prev - m_new) + jnp.sum(
                p, axis=1, keepdims=True)
            m_ref[...] = m_new
            pc_ref[...] += jnp.sum(pos_f, axis=1, keepdims=True)
            # sum(mask * log_prob) is folded algebraically: only sum(mask*z) is
            # accumulated; the log-denominator term is applied once at finalize.
            ps_ref[...] += jnp.sum(pos_f * z, axis=1, keepdims=True)

        @pl.when(jnp.logical_not(slow))
        def _fast():
            # Interior block: no iota, no masking, no where.
            m_prev = m_ref[...]
            m_new = jnp.maximum(m_prev, jnp.max(z, axis=1, keepdims=True))
            p = jnp.exp(z - m_new)
            if use_keys:
                pos_f = (rkey_ref[...] == ckey_ref[...]).astype(jnp.float32)
                if has_explicit_mask:
                    pos_f = pos_f * mask_ref[...].astype(jnp.float32)
            else:
                pos_f = mask_ref[...].astype(jnp.float32)
            update(p, pos_f, m_prev, m_new)

        @pl.when(slow)
        def _slow():
            # Block touches the self-contrast diagonal and/or padded columns.
            row_ids = i * tm + lax.broadcasted_iota(jnp.int32, (tm, 1), 0)
            col_ids = j * tk + lax.broadcasted_iota(jnp.int32, (1, tk), 1)
            off_diag = row_ids != col_ids               # (tm, tk) via broadcast
            col_valid = col_ids < n_contrast            # (1, tk)

            m_prev = m_ref[...]
            m_new = jnp.maximum(
                m_prev,
                jnp.max(jnp.where(col_valid, z, _NEG_BIG), axis=1,
                        keepdims=True))
            p = jnp.exp(jnp.where(col_valid & off_diag, z, _NEG_BIG) - m_new)
            if use_keys:
                pos = (rkey_ref[...] == ckey_ref[...]) & off_diag & col_valid
                pos_f = pos.astype(jnp.float32)
                if has_explicit_mask:
                    pos_f = pos_f * mask_ref[...].astype(jnp.float32)
            else:
                pos_f = mask_ref[...].astype(jnp.float32) * (
                    off_diag & col_valid).astype(jnp.float32)
            update(p, pos_f, m_prev, m_new)

        @pl.when(j == n_j - 1)
        def _finalize():
            log_denom = m_ref[...] + jnp.log(l_ref[...])
            pc = pc_ref[...]
            safe_pc = jnp.where(pc > 0.0, pc, 1.0)
            # Exact divide: runs once per row block, and an approx reciprocal
            # would leak ~1e-2 absolute error into the per-anchor loss.
            mean_log_prob_pos = (ps_ref[...] - pc * log_denom) / safe_pc
            row_valid = (i * tm + lax.broadcasted_iota(
                jnp.int32, (tm, 1), 0)) < n_anchor
            # Anchors with zero positives (padding rows, degenerate masks) give
            # 0 instead of NaN (intentional divergence from the PyTorch op).
            keep = row_valid & (pc > 0.0)
            out_ref[...] = jnp.where(keep, (-scale) * mean_log_prob_pos, 0.0)

    if has_explicit_mask:
        def kernel(frow_ref, fcol_ref, rkey_ref, ckey_ref, mask_ref,
                   out_ref, m_ref, l_ref, ps_ref, pc_ref):
            body(frow_ref, fcol_ref, rkey_ref, ckey_ref, mask_ref,
                 out_ref, m_ref, l_ref, ps_ref, pc_ref)
    else:
        # No dummy mask operand / DMA pipeline when there is no explicit mask.
        def kernel(frow_ref, fcol_ref, rkey_ref, ckey_ref,
                   out_ref, m_ref, l_ref, ps_ref, pc_ref):
            body(frow_ref, fcol_ref, rkey_ref, ckey_ref, None,
                 out_ref, m_ref, l_ref, ps_ref, pc_ref)
    return kernel


def supcon_loss_fordg(features, labels=None, domain_labels=None, mask=None,
                      temperature=0.07, contrast_mode="all",
                      base_temperature=0.07, block_rows=None, block_cols=None,
                      col_resident=None):
    """JAX/Pallas port of SupConLossfordg.forward."""
    if features.ndim < 3:
        raise ValueError("`features` needs to be [bsz, n_views, ...], "
                         "at least 3 dimensions are required")
    if features.ndim > 3:
        features = features.reshape(features.shape[0], features.shape[1], -1)
    bsz, n_views, d = features.shape

    if labels is not None and mask is not None:
        raise ValueError("Cannot define both `labels` and `mask`")

    has_explicit_mask = mask is not None
    if labels is None and mask is None:
        cls_vec = jnp.arange(bsz, dtype=jnp.int32)        # SimCLR: eye(bsz)
    elif labels is not None:
        labels = jnp.asarray(labels).reshape(-1)
        if labels.shape[0] != bsz:
            raise ValueError("Num of labels does not match num of features")
        cls_vec = labels.astype(jnp.int32)
    else:
        cls_vec = jnp.zeros((bsz,), dtype=jnp.int32)      # equality always true
        mask = jnp.asarray(mask, dtype=jnp.float32)

    if contrast_mode == "one":
        anchor_count = 1
    elif contrast_mode == "all":
        anchor_count = n_views
    else:
        raise ValueError(f"Unknown mode: {contrast_mode}")

    n_contrast = n_views * bsz
    n_anchor = anchor_count * bsz

    # contrast_feature = cat(unbind(features, dim=1), dim=0): view-major [N, d]
    cf = jnp.transpose(features, (1, 0, 2)).reshape(n_contrast, d)
    cls_full = jnp.tile(cls_vec, n_views)                 # [N]

    has_domain = domain_labels is not None
    if has_domain:
        if isinstance(domain_labels, (list, tuple)):
            dl = jnp.concatenate(
                [jnp.asarray(x).reshape(-1) for x in domain_labels], axis=0)
        else:
            dl = jnp.asarray(domain_labels).reshape(-1)
        if dl.shape[0] == bsz:
            dl = jnp.tile(dl, n_views)
        if dl.shape[0] != n_contrast:
            raise ValueError("domain_labels must cover bsz or n_views*bsz entries")
        dom_full = dl.astype(jnp.int32)

    # Pack class+domain into one int32 key -> a single in-kernel compare.
    use_keys = (not has_explicit_mask) or has_domain
    if has_domain:
        dmin = jnp.min(dom_full)
        drange = jnp.max(dom_full) - dmin + 1
        key_full = cls_full * drange + (dom_full - dmin)
    else:
        key_full = cls_full

    # ---- tiling: device-aware tile sizes, lane dim padded to 128 -------------
    dp = _round_up(d, 128)
    kind = ""
    try:
        kind = jax.devices()[0].device_kind.lower()
    except Exception:
        pass
    is_v7 = ("v7" in kind) or ("7x" in kind)
    vmem_budget = (48 << 20) if is_v7 else (96 << 20)

    def _est_vmem(tm_, tk_, resident_, n_blk_):
        e = 2 * tm_ * dp * 2                                    # frow  (bf16 x2)
        e += 2 * (n_blk_ if resident_ else 1) * dp * tk_ * 2    # fcol  (bf16 x2)
        if has_explicit_mask:
            e += 2 * tm_ * tk_ * 2                              # mask  (bf16 x2)
        e += 8 * tm_ * tk_ * 4                                  # f32 temporaries
        e += 6 * tm_ * 128 * 4                                  # scratch/out pads
        return e

    def _want_resident(tk_, n_blk_):
        if col_resident is not None:
            return bool(col_resident)
        cap = (6 << 20) if is_v7 else (12 << 20)
        return 2 * n_blk_ * dp * tk_ * 2 <= cap

    if block_rows is not None:
        tm = block_rows
    else:
        tm = min(512, _round_up(n_anchor, 8))
        # v7x has 2 TensorCores: keep >= 2 row blocks so both get work.
        if is_v7 and n_anchor > 8 and _round_up(n_anchor, tm) // tm < 2:
            tm = _round_up(-(-n_anchor // 2), 8)
    if block_cols is not None:
        tk = block_cols
    else:
        tk = min(512 if is_v7 else 1024, _round_up(n_contrast, 128))
        while tk > 128:
            n_blk = _round_up(n_contrast, tk) // tk
            if _est_vmem(tm, tk, _want_resident(tk, n_blk), n_blk) <= vmem_budget:
                break
            tk = max(128, _round_up(tk // 2, 128))
    if block_rows is None:
        while tm > 8:
            n_blk = _round_up(n_contrast, tk) // tk
            if _est_vmem(tm, tk, _want_resident(tk, n_blk), n_blk) <= vmem_budget:
                break
            tm = max(8, _round_up(tm // 2, 8))
    if tm % 8 != 0 or tk % 128 != 0:
        raise ValueError("block_rows must be a multiple of 8, block_cols of 128")

    np_rows = _round_up(n_anchor, tm)
    np_cols = _round_up(n_contrast, tk)
    n_col_blocks = np_cols // tk
    resident = _want_resident(tk, n_col_blocks)
    pad_exists = np_cols > n_contrast

    # bf16 features feed the MXU at native rate; accumulation stays f32.
    cf_bf16 = cf.astype(jnp.bfloat16)
    row_feat = jnp.zeros((np_rows, dp), jnp.bfloat16).at[:n_anchor, :d].set(
        cf_bf16[:n_anchor])
    # Contrast features pre-transposed to (dp, N) and pre-blocked to
    # (n_col_blocks, dp, tk) so the kernel never needs an in-kernel transpose.
    col_t = jnp.zeros((dp, np_cols), jnp.bfloat16).at[:d, :n_contrast].set(
        cf_bf16.T)
    col_feat = col_t.reshape(dp, n_col_blocks, tk).transpose(1, 0, 2)

    rkey = jnp.zeros((np_rows, 1), jnp.int32).at[:n_anchor, 0].set(
        key_full[:n_anchor])
    ckey = jnp.zeros((1, np_cols), jnp.int32).at[0, :n_contrast].set(key_full)

    if resident:
        # Whole contrast matrix stays VMEM-resident: DMA'd once for the kernel.
        fcol_spec = pl.BlockSpec((n_col_blocks, dp, tk), lambda i, j: (0, 0, 0))
    else:
        fcol_spec = pl.BlockSpec((1, dp, tk), lambda i, j: (j, 0, 0))

    in_specs = [
        pl.BlockSpec((tm, dp), lambda i, j: (i, 0)),   # anchor feature rows
        fcol_spec,                                     # contrast features (k,n)
        pl.BlockSpec((tm, 1), lambda i, j: (i, 0)),    # anchor keys
        pl.BlockSpec((1, tk), lambda i, j: (0, j)),    # contrast keys
    ]
    args = [row_feat, col_feat, rkey, ckey]
    if has_explicit_mask:
        mask_full = jnp.tile(mask, (anchor_count, n_views)).astype(jnp.bfloat16)
        mask_arg = jnp.zeros((np_rows, np_cols), jnp.bfloat16).at[
            :n_anchor, :n_contrast].set(mask_full)
        in_specs.append(pl.BlockSpec((tm, tk), lambda i, j: (i, j)))
        args.append(mask_arg)

    kernel = _make_supcon_kernel(
        inv_temp=1.0 / float(temperature),
        scale=float(temperature) / float(base_temperature),
        n_anchor=n_anchor, n_contrast=n_contrast, tm=tm, tk=tk,
        pad_exists=pad_exists, use_keys=use_keys,
        has_explicit_mask=has_explicit_mask, col_resident=resident)

    est = _est_vmem(tm, tk, resident, n_col_blocks)
    cp_kwargs = dict(dimension_semantics=("parallel", "arbitrary"))
    if est > (24 << 20):
        cp_kwargs["vmem_limit_bytes"] = int(min(vmem_budget,
                                                _round_up(est, 1 << 20)))

    per_anchor = pl.pallas_call(
        kernel,
        out_shape=jax.ShapeDtypeStruct((np_rows, 1), jnp.float32),
        grid=(np_rows // tm, np_cols // tk),
        in_specs=in_specs,
        out_specs=pl.BlockSpec((tm, 1), lambda i, j: (i, 0)),
        scratch_shapes=[pltpu.VMEM((tm, 1), jnp.float32) for _ in range(4)],
        compiler_params=pltpu.CompilerParams(**cp_kwargs),
    )(*args)

    # loss.view(anchor_count, batch_size).mean() == sum over anchors / n_anchor
    # (padding rows contribute exactly 0).
    return jnp.sum(per_anchor) / float(n_anchor)


def _reference(features, labels=None, domain_labels=None, mask=None,
               temperature=0.07, base_temperature=0.07):
    """Pure-JAX f32 reference (contrast_mode='all') for sanity checking."""
    bsz, n_views, d = features.shape
    if labels is None and mask is None:
        mask = jnp.eye(bsz, dtype=jnp.float32)
    elif labels is not None:
        labels = labels.reshape(-1, 1)
        mask = (labels == labels.T).astype(jnp.float32)
    else:
        mask = mask.astype(jnp.float32)
    cf = jnp.transpose(features, (1, 0, 2)).reshape(n_views * bsz, d)
    N = n_views * bsz
    logits = (cf @ cf.T) / temperature
    logits = logits - jnp.max(logits, axis=1, keepdims=True)
    lmask = 1.0 - jnp.eye(N, dtype=jnp.float32)
    mask_full = jnp.tile(mask, (n_views, n_views)) * lmask
    if domain_labels is not None:
        dl = jnp.concatenate(
            [jnp.asarray(x).reshape(-1) for x in domain_labels]).reshape(-1, 1)
        mask_full = mask_full * (dl == dl.T).astype(jnp.float32)
    exp_logits = jnp.exp(logits) * lmask
    log_prob = logits - jnp.log(exp_logits.sum(1, keepdims=True))
    mlpp = (mask_full * log_prob).sum(1) / mask_full.sum(1)
    return jnp.mean(-(temperature / base_temperature) * mlpp)


if __name__ == "__main__":
    key = jax.random.PRNGKey(0)
    k1, k2, k3, k4, k5, k6, k7 = jax.random.split(key, 7)

    # Test 1: small shapes (single-tile grid), supervised labels path.
    bsz, n_views, d = 8, 2, 32
    feats = jax.random.normal(k1, (bsz, n_views, d), dtype=jnp.float32)
    feats = feats / jnp.linalg.norm(feats, axis=-1, keepdims=True)
    labels = jax.random.randint(k2, (bsz,), 0, 3)

    loss = jax.block_until_ready(supcon_loss_fordg(feats, labels=labels))
    ref = _reference(feats, labels=labels)
    assert jnp.isfinite(loss), "loss is not finite"
    # bf16 MXU inputs -> looser tolerance vs the f32 reference.
    assert jnp.allclose(loss, ref, rtol=2e-2, atol=2e-2), (loss, ref)

    # Test 2: forced small tiles -> multi-block grid (fast interior blocks +
    # slow diag/padding blocks, resident contrast features), labels + domain
    # labels path (packed keys).
    bsz2, n_views2, d2 = 72, 2, 40
    feats2 = jax.random.normal(k3, (bsz2, n_views2, d2), dtype=jnp.float32)
    feats2 = feats2 / jnp.linalg.norm(feats2, axis=-1, keepdims=True)
    labels2 = jax.random.randint(k4, (bsz2,), 0, 3)
    dvec = jax.random.randint(k5, (bsz2,), 0, 2)
    domain_list = [dvec, dvec]

    loss2 = jax.block_until_ready(
        supcon_loss_fordg(feats2, labels=labels2, domain_labels=domain_list,
                          block_rows=64, block_cols=128))
    ref2 = _reference(feats2, labels=labels2, domain_labels=domain_list)
    assert jnp.isfinite(loss2), "loss2 is not finite"
    assert jnp.allclose(loss2, ref2, rtol=2e-2, atol=2e-2), (loss2, ref2)

    # Test 3: explicit-mask path (bf16 mask stream), non-resident contrast
    # features, multi-block grid so both fast and slow paths run with the mask.
    bsz3, n_views3, d3 = 80, 2, 48
    feats3 = jax.random.normal(k6, (bsz3, n_views3, d3), dtype=jnp.float32)
    feats3 = feats3 / jnp.linalg.norm(feats3, axis=-1, keepdims=True)
    labels3 = jax.random.randint(k7, (bsz3,), 0, 4)
    mask3 = (labels3[:, None] == labels3[None, :]).astype(jnp.float32)

    loss3 = jax.block_until_ready(
        supcon_loss_fordg(feats3, mask=mask3, block_rows=64, block_cols=128,
                          col_resident=False))
    ref3 = _reference(feats3, mask=mask3)
    assert jnp.isfinite(loss3), "loss3 is not finite"
    assert jnp.allclose(loss3, ref3, rtol=2e-2, atol=2e-2), (loss3, ref3)

    print("KERNEL_OK")
</pallas_src>

<mosaic_0001>
module attributes {stable_mosaic.version = 11 : i64} {
  func.func @kernel(%arg0: i32, %arg1: i32, %arg2: memref<16x128xbf16, #tpu.memory_space<vmem>>, %arg3: memref<1x128x128xbf16, #tpu.memory_space<vmem>>, %arg4: memref<16x1xi32, #tpu.memory_space<vmem>>, %arg5: memref<1x128xi32, #tpu.memory_space<vmem>>, %arg6: memref<16x1xf32, #tpu.memory_space<vmem>>, %arg7: memref<16x1xf32, #tpu.memory_space<vmem>>, %arg8: memref<16x1xf32, #tpu.memory_space<vmem>>, %arg9: memref<16x1xf32, #tpu.memory_space<vmem>>, %arg10: memref<16x1xf32, #tpu.memory_space<vmem>>) attributes {dimension_semantics = [#tpu.dimension_semantics<parallel>, #tpu.dimension_semantics<arbitrary>], iteration_bounds = array<i64: 1, 1>, scalar_prefetch = 0 : i64, scratch_operands = 4 : i64, tpu.core_type = #tpu.core_type<tc>, window_params = [{transform_indices = @transform_0, window_bounds = array<i64: 16, 128>}, {pipeline_mode = #tpu.pipeline_mode<synchronous>, transform_indices = @transform_1, window_bounds = array<i64: 1, 128, 128>}, {transform_indices = @transform_2, window_bounds = array<i64: 16, 1>}, {transform_indices = @transform_3, window_bounds = array<i64: 1, 128>}, {transform_indices = @transform_4, window_bounds = array<i64: 16, 1>}]} {
    %c0_i32 = arith.constant 0 : i32
    %0 = arith.cmpi eq, %arg1, %c0_i32 : i32
    %1 = arith.extui %0 : i1 to i32
    %c0_i32_0 = arith.constant 0 : i32
    %2 = arith.cmpi ne, %1, %c0_i32_0 : i32
    scf.if %2 {
      %cst_13 = arith.constant -1.000000e+30 : f32
      %29 = vector.broadcast %cst_13 : f32 to vector<16x1xf32>
      %c0_14 = arith.constant 0 : index
      %c0_15 = arith.constant 0 : index
      %30 = vector.load %arg7[%c0_14, %c0_15] : memref<16x1xf32, #tpu.memory_space<vmem>>, vector<16x1xf32>
      tpu.vector_store %arg7[%c0_14, %c0_15], %29 {strides = array<i32>} : memref<16x1xf32, #tpu.memory_space<vmem>>, vector<16x1xf32>,
      %cst_16 = arith.constant 0.000000e+00 : f32
      %31 = vector.broadcast %cst_16 : f32 to vector<16x1xf32>
      %c0_17 = arith.constant 0 : index
      %c0_18 = arith.constant 0 : index
      %32 = vector.load %arg8[%c0_17, %c0_18] : memref<16x1xf32, #tpu.memory_space<vmem>>, vector<16x1xf32>
      tpu.vector_store %arg8[%c0_17, %c0_18], %31 {strides = array<i32>} : memref<16x1xf32, #tpu.memory_space<vmem>>, vector<16x1xf32>,
      %cst_19 = arith.constant 0.000000e+00 : f32
      %33 = vector.broadcast %cst_19 : f32 to vector<16x1xf32>
      %c0_20 = arith.constant 0 : index
      %c0_21 = arith.constant 0 : index
      %34 = vector.load %arg9[%c0_20, %c0_21] : memref<16x1xf32, #tpu.memory_space<vmem>>, vector<16x1xf32>
      tpu.vector_store %arg9[%c0_20, %c0_21], %33 {strides = array<i32>} : memref<16x1xf32, #tpu.memory_space<vmem>>, vector<16x1xf32>,
      %cst_22 = arith.constant 0.000000e+00 : f32
      %35 = vector.broadcast %cst_22 : f32 to vector<16x1xf32>
      %c0_23 = arith.constant 0 : index
      %c0_24 = arith.constant 0 : index
      %36 = vector.load %arg10[%c0_23, %c0_24] : memref<16x1xf32, #tpu.memory_space<vmem>>, vector<16x1xf32>
      tpu.vector_store %arg10[%c0_23, %c0_24], %35 {strides = array<i32>} : memref<16x1xf32, #tpu.memory_space<vmem>>, vector<16x1xf32>,
    } else {
    }
    %3 = arith.index_cast %arg1 : i32 to index
    %c0 = arith.constant 0 : index
    %c0_1 = arith.constant 0 : index
    %4 = vector.load %arg3[%3, %c0, %c0_1] : memref<1x128x128xbf16, #tpu.memory_space<vmem>>, vector<1x128x128xbf16>
    %5 = vector.shape_cast %4 : vector<1x128x128xbf16> to vector<128x128xbf16>
    %c0_2 = arith.constant 0 : index
    %c0_3 = arith.constant 0 : index
    %6 = vector.load %arg2[%c0_2, %c0_3] : memref<16x128xbf16, #tpu.memory_space<vmem>>, vector<16x128xbf16>
    %cst = arith.constant dense<0.000000e+00> : vector<16x128xf32>
    %7 = tpu.matmul %6, %5, %cst {dimension_numbers = #tpu.dot_dimension_numbers<[1], [0], [0], [1], [0, 0, 1, 1], [], []>} : vector<16x128xbf16>, vector<128x128xbf16>, vector<16x128xf32> -> vector<16x128xf32>
    %cst_4 = arith.constant 14.2857141 : f32
    %8 = vector.broadcast %cst_4 : f32 to vector<16x128xf32>
    %9 = arith.mulf %7, %8 : vector<16x128xf32>
    %c0_i32_5 = arith.constant 0 : i32
    %10 = arith.cmpi eq, %arg1, %c0_i32_5 : i32
    %c16_i32 = arith.constant 16 : i32
    %11 = arith.muli %arg0, %c16_i32 : i32
    %c1_i32 = arith.constant 1 : i32
    %12 = arith.addi %arg1, %c1_i32 : i32
    %c128_i32 = arith.constant 128 : i32
    %13 = arith.muli %12, %c128_i32 : i32
    %14 = arith.cmpi slt, %11, %13 : i32
    %c128_i32_6 = arith.constant 128 : i32
    %15 = arith.muli %arg1, %c128_i32_6 : i32
    %c1_i32_7 = arith.constant 1 : i32
    %16 = arith.addi %arg0, %c1_i32_7 : i32
    %c16_i32_8 = arith.constant 16 : i32
    %17 = arith.muli %16, %c16_i32_8 : i32
    %18 = arith.cmpi slt, %15, %17 : i32
    %19 = arith.andi %14, %18 : i1
    %20 = arith.ori %10, %19 : i1
    %true = arith.constant true
    %21 = arith.xori %20, %true : i1
    %22 = arith.extui %21 : i1 to i32
    %c0_i32_9 = arith.constant 0 : i32
    %23 = arith.cmpi ne, %22, %c0_i32_9 : i32
    scf.if %23 {
      %c0_13 = arith.constant 0 : index
      %c0_14 = arith.constant 0 : index
      %29 = vector.load %arg7[%c0_13, %c0_14] : memref<16x1xf32, #tpu.memory_space<vmem>>, vector<16x1xf32>
      %cst_15 = arith.constant dense<0xFF800000> : vector<16xf32>
      %30 = vector.multi_reduction <maximumf>, %9, %cst_15 [1] : vector<16x128xf32> to vector<16xf32>
      %31 = vector.shape_cast %30 : vector<16xf32> to vector<16x1xf32>
      %32 = arith.maximumf %29, %31 : vector<16x1xf32>
      %33 = vector.broadcast %32 : vector<16x1xf32> to vector<16x128xf32>
      %34 = arith.subf %9, %33 : vector<16x128xf32>
      %35 = math.exp %34 : vector<16x128xf32>
      %c0_16 = arith.constant 0 : index
      %c0_17 = arith.constant 0 : index
      %36 = vector.load %arg4[%c0_16, %c0_17] : memref<16x1xi32, #tpu.memory_space<vmem>>, vector<16x1xi32>
      %c0_18 = arith.constant 0 : index
      %c0_19 = arith.constant 0 : index
      %37 = vector.load %arg5[%c0_18, %c0_19] : memref<1x128xi32, #tpu.memory_space<vmem>>, vector<1x128xi32>
      %38 = vector.broadcast %36 : vector<16x1xi32> to vector<16x128xi32>
      %39 = vector.broadcast %37 : vector<1x128xi32> to vector<16x128xi32>
      %40 = arith.cmpi eq, %38, %39 : vector<16x128xi32>
      %41 = arith.extui %40 : vector<16x128xi1> to vector<16x128xi32>
      %42 = arith.sitofp %41 : vector<16x128xi32> to vector<16x128xf32>
      %c0_20 = arith.constant 0 : index
      %c0_21 = arith.constant 0 : index
      %43 = vector.load %arg8[%c0_20, %c0_21] : memref<16x1xf32, #tpu.memory_space<vmem>>, vector<16x1xf32>
      %44 = arith.subf %29, %32 : vector<16x1xf32>
      %45 = math.exp %44 : vector<16x1xf32>
      %46 = arith.mulf %43, %45 : vector<16x1xf32>
      %cst_22 = arith.constant dense<0.000000e+00> : vector<16xf32>
      %47 = vector.multi_reduction <add>, %35, %cst_22 [1] : vector<16x128xf32> to vector<16xf32>
      %48 = vector.shape_cast %47 : vector<16xf32> to vector<16x1xf32>
      %49 = arith.addf %46, %48 : vector<16x1xf32>
      %c0_23 = arith.constant 0 : index
      %c0_24 = arith.constant 0 : index
      %50 = vector.load %arg8[%c0_23, %c0_24] : memref<16x1xf32, #tpu.memory_space<vmem>>, vector<16x1xf32>
      tpu.vector_store %arg8[%c0_23, %c0_24], %49 {strides = array<i32>} : memref<16x1xf32, #tpu.memory_space<vmem>>, vector<16x1xf32>,
      %c0_25 = arith.constant 0 : index
      %c0_26 = arith.constant 0 : index
      %51 = vector.load %arg7[%c0_25, %c0_26] : memref<16x1xf32, #tpu.memory_space<vmem>>, vector<16x1xf32>
      tpu.vector_store %arg7[%c0_25, %c0_26], %32 {strides = array<i32>} : memref<16x1xf32, #tpu.memory_space<vmem>>, vector<16x1xf32>,
      %c0_27 = arith.constant 0 : index
      %c0_28 = arith.constant 0 : index
      %52 = vector.load %arg10[%c0_27, %c0_28] : memref<16x1xf32, #tpu.memory_space<vmem>>, vector<16x1xf32>
      %cst_29 = arith.constant dense<0.000000e+00> : vector<16xf32>
      %53 = vector.multi_reduction <add>, %42, %cst_29 [1] : vector<16x128xf32> to vector<16xf32>
      %54 = vector.shape_cast %53 : vector<16xf32> to vector<16x1xf32>
      %55 = arith.addf %52, %54 : vector<16x1xf32>
      %c0_30 = arith.constant 0 : index
      %c0_31 = arith.constant 0 : index
      %56 = vector.load %arg10[%c0_30, %c0_31] : memref<16x1xf32, #tpu.memory_space<vmem>>, vector<16x1xf32>
      tpu.vector_store %arg10[%c0_30, %c0_31], %55 {strides = array<i32>} : memref<16x1xf32, #tpu.memory_space<vmem>>, vector<16x1xf32>,
      %c0_32 = arith.constant 0 : index
      %c0_33 = arith.constant 0 : index
      %57 = vector.load %arg9[%c0_32, %c0_33] : memref<16x1xf32, #tpu.memory_space<vmem>>, vector<16x1xf32>
      %58 = arith.mulf %42, %9 : vector<16x128xf32>
      %cst_34 = arith.constant dense<0.000000e+00> : vector<16xf32>
      %59 = vector.multi_reduction <add>, %58, %cst_34 [1] : vector<16x128xf32> to vector<16xf32>
      %60 = vector.shape_cast %59 : vector<16xf32> to vector<16x1xf32>
      %61 = arith.addf %57, %60 : vector<16x1xf32>
      %c0_35 = arith.constant 0 : index
      %c0_36 = arith.constant 0 : index
      %62 = vector.load %arg9[%c0_35, %c0_36] : memref<16x1xf32, #tpu.memory_space<vmem>>, vector<16x1xf32>
      tpu.vector_store %arg9[%c0_35, %c0_36], %61 {strides = array<i32>} : memref<16x1xf32, #tpu.memory_space<vmem>>, vector<16x1xf32>,
    } else {
    }
    %24 = arith.extui %20 : i1 to i32
    %c0_i32_10 = arith.constant 0 : i32
    %25 = arith.cmpi ne, %24, %c0_i32_10 : i32
    scf.if %25 {
      %c16_i32_13 = arith.constant 16 : i32
      %29 = arith.muli %arg0, %c16_i32_13 : i32
      %30 = tpu.iota {dimensions = array<i32: 0>} : vector<16x1xi32>
      %31 = vector.broadcast %29 : i32 to vector<16x1xi32>
      %32 = arith.addi %31, %30 : vector<16x1xi32>
      %c128_i32_14 = arith.constant 128 : i32
      %33 = arith.muli %arg1, %c128_i32_14 : i32
      %34 = tpu.iota {dimensions = array<i32: 1>} : vector<1x128xi32>
      %35 = vector.broadcast %33 : i32 to vector<1x128xi32>
      %36 = arith.addi %35, %34 : vector<1x128xi32>
      %37 = vector.broadcast %32 : vector<16x1xi32> to vector<16x128xi32>
      %38 = vector.broadcast %36 : vector<1x128xi32> to vector<16x128xi32>
      %39 = arith.cmpi ne, %37, %38 : vector<16x128xi32>
      %c16_i32_15 = arith.constant 16 : i32
      %40 = vector.broadcast %c16_i32_15 : i32 to vector<1x128xi32>
      %41 = arith.cmpi slt, %36, %40 : vector<1x128xi32>
      %c0_16 = arith.constant 0 : index
      %c0_17 = arith.constant 0 : index
      %42 = vector.load %arg7[%c0_16, %c0_17] : memref<16x1xf32, #tpu.memory_space<vmem>>, vector<16x1xf32>
      %cst_18 = arith.constant -1.000000e+30 : f32
      %43 = vector.shape_cast %41 : vector<1x128xi1> to vector<1x128xi1>
      %44 = vector.broadcast %43 : vector<1x128xi1> to vector<16x128xi1>
      %45 = vector.broadcast %cst_18 : f32 to vector<16x128xf32>
      %46 = arith.select %44, %9, %45 : vector<16x128xi1>, vector<16x128xf32>
      %cst_19 = arith.constant dense<0xFF800000> : vector<16xf32>
      %47 = vector.multi_reduction <maximumf>, %46, %cst_19 [1] : vector<16x128xf32> to vector<16xf32>
      %48 = vector.shape_cast %47 : vector<16xf32> to vector<16x1xf32>
      %49 = arith.maximumf %42, %48 : vector<16x1xf32>
      %50 = vector.broadcast %41 : vector<1x128xi1> to vector<16x128xi1>
      %51 = arith.andi %50, %39 : vector<16x128xi1>
      %cst_20 = arith.constant -1.000000e+30 : f32
      %52 = vector.broadcast %cst_20 : f32 to vector<16x128xf32>
      %53 = arith.select %51, %9, %52 : vector<16x128xi1>, vector<16x128xf32>
      %54 = vector.broadcast %49 : vector<16x1xf32> to vector<16x128xf32>
      %55 = arith.subf %53, %54 : vector<16x128xf32>
      %56 = math.exp %55 : vector<16x128xf32>
      %c0_21 = arith.constant 0 : index
      %c0_22 = arith.constant 0 : index
      %57 = vector.load %arg4[%c0_21, %c0_22] : memref<16x1xi32, #tpu.memory_space<vmem>>, vector<16x1xi32>
      %c0_23 = arith.constant 0 : index
      %c0_24 = arith.constant 0 : index
      %58 = vector.load %arg5[%c0_23, %c0_24] : memref<1x128xi32, #tpu.memory_space<vmem>>, vector<1x128xi32>
      %59 = vector.broadcast %57 : vector<16x1xi32> to vector<16x128xi32>
      %60 = vector.broadcast %58 : vector<1x128xi32> to vector<16x128xi32>
      %61 = arith.cmpi eq, %59, %60 : vector<16x128xi32>
      %62 = arith.andi %61, %39 : vector<16x128xi1>
      %63 = vector.broadcast %41 : vector<1x128xi1> to vector<16x128xi1>
      %64 = arith.andi %62, %63 : vector<16x128xi1>
      %65 = arith.extui %64 : vector<16x128xi1> to vector<16x128xi32>
      %66 = arith.sitofp %65 : vector<16x128xi32> to vector<16x128xf32>
      %c0_25 = arith.constant 0 : index
      %c0_26 = arith.constant 0 : index
      %67 = vector.load %arg8[%c0_25, %c0_26] : memref<16x1xf32, #tpu.memory_space<vmem>>, vector<16x1xf32>
      %68 = arith.subf %42, %49 : vector<16x1xf32>
      %69 = math.exp %68 : vector<16x1xf32>
      %70 = arith.mulf %67, %69 : vector<16x1xf32>
      %cst_27 = arith.constant dense<0.000000e+00> : vector<16xf32>
      %71 = vector.multi_reduction <add>, %56, %cst_27 [1] : vector<16x128xf32> to vector<16xf32>
      %72 = vector.shape_cast %71 : vector<16xf32> to vector<16x1xf32>
      %73 = arith.addf %70, %72 : vector<16x1xf32>
      %c0_28 = arith.constant 0 : index
      %c0_29 = arith.constant 0 : index
      %74 = vector.load %arg8[%c0_28, %c0_29] : memref<16x1xf32, #tpu.memory_space<vmem>>, vector<16x1xf32>
      tpu.vector_store %arg8[%c0_28, %c0_29], %73 {strides = array<i32>} : memref<16x1xf32, #tpu.memory_space<vmem>>, vector<16x1xf32>,
      %c0_30 = arith.constant 0 : index
      %c0_31 = arith.constant 0 : index
      %75 = vector.load %arg7[%c0_30, %c0_31] : memref<16x1xf32, #tpu.memory_space<vmem>>, vector<16x1xf32>
      tpu.vector_store %arg7[%c0_30, %c0_31], %49 {strides = array<i32>} : memref<16x1xf32, #tpu.memory_space<vmem>>, vector<16x1xf32>,
      %c0_32 = arith.constant 0 : index
      %c0_33 = arith.constant 0 : index
      %76 = vector.load %arg10[%c0_32, %c0_33] : memref<16x1xf32, #tpu.memory_space<vmem>>, vector<16x1xf32>
      %cst_34 = arith.constant dense<0.000000e+00> : vector<16xf32>
      %77 = vector.multi_reduction <add>, %66, %cst_34 [1] : vector<16x128xf32> to vector<16xf32>
      %78 = vector.shape_cast %77 : vector<16xf32> to vector<16x1xf32>
      %79 = arith.addf %76, %78 : vector<16x1xf32>
      %c0_35 = arith.constant 0 : index
      %c0_36 = arith.constant 0 : index
      %80 = vector.load %arg10[%c0_35, %c0_36] : memref<16x1xf32, #tpu.memory_space<vmem>>, vector<16x1xf32>
      tpu.vector_store %arg10[%c0_35, %c0_36], %79 {strides = array<i32>} : memref<16x1xf32, #tpu.memory_space<vmem>>, vector<16x1xf32>,
      %c0_37 = arith.constant 0 : index
      %c0_38 = arith.constant 0 : index
      %81 = vector.load %arg9[%c0_37, %c0_38] : memref<16x1xf32, #tpu.memory_space<vmem>>, vector<16x1xf32>
      %82 = arith.mulf %66, %9 : vector<16x128xf32>
      %cst_39 = arith.constant dense<0.000000e+00> : vector<16xf32>
      %83 = vector.multi_reduction <add>, %82, %cst_39 [1] : vector<16x128xf32> to vector<16xf32>
      %84 = vector.shape_cast %83 : vector<16xf32> to vector<16x1xf32>
      %85 = arith.addf %81, %84 : vector<16x1xf32>
      %c0_40 = arith.constant 0 : index
      %c0_41 = arith.constant 0 : index
      %86 = vector.load %arg9[%c0_40, %c0_41] : memref<16x1xf32, #tpu.memory_space<vmem>>, vector<16x1xf32>
      tpu.vector_store %arg9[%c0_40, %c0_41], %85 {strides = array<i32>} : memref<16x1xf32, #tpu.memory_space<vmem>>, vector<16x1xf32>,
    } else {
    }
    %c0_i32_11 = arith.constant 0 : i32
    %26 = arith.cmpi eq, %arg1, %c0_i32_11 : i32
    %27 = arith.extui %26 : i1 to i32
    %c0_i32_12 = arith.constant 0 : i32
    %28 = arith.cmpi ne, %27, %c0_i32_12 : i32
    scf.if %28 {
      %c0_13 = arith.constant 0 : index
      %c0_14 = arith.constant 0 : index
      %29 = vector.load %arg7[%c0_13, %c0_14] : memref<16x1xf32, #tpu.memory_space<vmem>>, vector<16x1xf32>
      %c0_15 = arith.constant 0 : index
      %c0_16 = arith.constant 0 : index
      %30 = vector.load %arg8[%c0_15, %c0_16] : memref<16x1xf32, #tpu.memory_space<vmem>>, vector<16x1xf32>
      %31 = math.log %30 : vector<16x1xf32>
      %32 = arith.addf %29, %31 : vector<16x1xf32>
      %c0_17 = arith.constant 0 : index
      %c0_18 = arith.constant 0 : index
      %33 = vector.load %arg10[%c0_17, %c0_18] : memref<16x1xf32, #tpu.memory_space<vmem>>, vector<16x1xf32>
      %cst_19 = arith.constant 0.000000e+00 : f32
      %34 = vector.broadcast %cst_19 : f32 to vector<16x1xf32>
      %35 = arith.cmpf ogt, %33, %34 : vector<16x1xf32>
      %cst_20 = arith.constant 1.000000e+00 : f32
      %36 = vector.broadcast %cst_20 : f32 to vector<16x1xf32>
      %37 = arith.select %35, %33, %36 : vector<16x1xi1>, vector<16x1xf32>
      %c0_21 = arith.constant 0 : index
      %c0_22 = arith.constant 0 : index
      %38 = vector.load %arg9[%c0_21, %c0_22] : memref<16x1xf32, #tpu.memory_space<vmem>>, vector<16x1xf32>
      %39 = arith.mulf %33, %32 : vector<16x1xf32>
      %40 = arith.subf %38, %39 : vector<16x1xf32>
      %41 = arith.divf %40, %37 : vector<16x1xf32>
      %c16_i32_23 = arith.constant 16 : i32
      %42 = arith.muli %arg0, %c16_i32_23 : i32
      %43 = tpu.iota {dimensions = array<i32: 0>} : vector<16x1xi32>
      %44 = vector.broadcast %42 : i32 to vector<16x1xi32>
      %45 = arith.addi %44, %43 : vector<16x1xi32>
      %c16_i32_24 = arith.constant 16 : i32
      %46 = vector.broadcast %c16_i32_24 : i32 to vector<16x1xi32>
      %47 = arith.cmpi slt, %45, %46 : vector<16x1xi32>
      %cst_25 = arith.constant 0.000000e+00 : f32
      %48 = vector.broadcast %cst_25 : f32 to vector<16x1xf32>
      %49 = arith.cmpf ogt, %33, %48 : vector<16x1xf32>
      %50 = arith.andi %47, %49 : vector<16x1xi1>
      %cst_26 = arith.constant -1.000000e+00 : f32
      %51 = vector.broadcast %cst_26 : f32 to vector<16x1xf32>
      %52 = arith.mulf %51, %41 : vector<16x1xf32>
      %cst_27 = arith.constant 0.000000e+00 : f32
      %53 = vector.broadcast %cst_27 : f32 to vector<16x1xf32>
      %54 = arith.select %50, %52, %53 : vector<16x1xi1>, vector<16x1xf32>
      %c0_28 = arith.constant 0 : index
      %c0_29 = arith.constant 0 : index
      %55 = vector.load %arg6[%c0_28, %c0_29] : memref<16x1xf32, #tpu.memory_space<vmem>>, vector<16x1xf32>
      tpu.vector_store %arg6[%c0_28, %c0_29], %54 {strides = array<i32>} : memref<16x1xf32, #tpu.memory_space<vmem>>, vector<16x1xf32>,
    } else {
    }
    return
  }
  func.func @transform_0(%arg0: i32, %arg1: i32) -> (i32, i32) {
    %c0_i32 = arith.constant 0 : i32
    %c0_i32_0 = arith.constant 0 : i32
    return %arg0, %c0_i32 : i32, i32
  }
  func.func @transform_1(%arg0: i32, %arg1: i32) -> (i32, i32, i32) {
    %c0_i32 = arith.constant 0 : i32
    %c0_i32_0 = arith.constant 0 : i32
    %c0_i32_1 = arith.constant 0 : i32
    %c0_i32_2 = arith.constant 0 : i32
    return %c0_i32, %c0_i32_0, %c0_i32_1 : i32, i32, i32
  }
  func.func @transform_2(%arg0: i32, %arg1: i32) -> (i32, i32) {
    %c0_i32 = arith.constant 0 : i32
    %c0_i32_0 = arith.constant 0 : i32
    return %arg0, %c0_i32 : i32, i32
  }
  func.func @transform_3(%arg0: i32, %arg1: i32) -> (i32, i32) {
    %c0_i32 = arith.constant 0 : i32
    %c0_i32_0 = arith.constant 0 : i32
    return %c0_i32, %arg1 : i32, i32
  }
  func.func @transform_4(%arg0: i32, %arg1: i32) -> (i32, i32) {
    %c0_i32 = arith.constant 0 : i32
    %c0_i32_0 = arith.constant 0 : i32
    return %arg0, %c0_i32 : i32, i32
  }
}

</mosaic_0001>

<bundles_post_ra>
// kernel: tpu_custom_call.1
= control target key start
LH: loop header
LB: loop body
LE: loop exit
PB: predicated region body
PF: predicated region fallthrough
CT: control target
= control target key end

     0   :  { %9 = vsyncpa [#allocation7], 0  ;;  %s523_s18 = smov [#allocation6]   ;;  %s524_s20 = smov 64   ;;  %s637_s0 = inlined_call_operand.vmem [shape: bf16[16,128], index: 0, kind: input, shape index: {}]   ;;  %s638_s1 = inlined_call_operand.hbm [shape: bf16[1,128,128], index: 1, kind: input, shape index: {}]   ;;  %s639_s2 = inlined_call_operand.vmem [shape: s32[16,1], index: 2, kind: input, shape index: {}]   ;;  %s640_s3 = inlined_call_operand.vmem [shape: s32[1,128], index: 3, kind: input, shape index: {}]   ;;  %s641_s4 = inlined_call_operand.vmem [shape: f32[16,1], index: 4, kind: output, shape index: {}]  }
   0x1   :  { %s16_s17 = sshll.u32 %s638_s1, 4  ;;  %s18_s19 = sshll.u32 %s523_s18, 4  ;;  %s17_s17 = int_to_ptr.hbm [resolvable:$true] %s16_s17  ;;  %s19_s19 = int_to_ptr.vmem [resolvable:$true] %s18_s19 }
   0x2   :  { %s525_s21 = smov 4  }
   0x3   :  { %24 = dma.hbm_to_vmem [thread:$0]  %s17_s17, 1024, %s19_s19, [#allocation7], %s524_s20, %s524_s20, %s525_s21  }
   0x4   :  { %521 = dma.done.wait [#allocation7], 1024  }
   0x5   :  { %522 = vsyncadd [#allocation7], 4294966272  ;;  %v469_v0 = vld [vmem:[#allocation6 + $0x38] sm:$0xff]  ;;  %v468_v1 = vld [vmem:[#allocation6 + $0x30] sm:$0xff]  ;;  %v526_v2 = vmov 0   ;;  %v151_v12 = vlaneseq  ;;  %v527_v20 = vmov 0.0  }
   0x6   :  { %121 = vmatpush.bf16.msra.mxu0 %v469_v0  ;;  %478 = vset.pattern.permute.xlu2 %v526_v2  ;;  %v196_v3 = vld [vmem:[%s639_s2] sm:$0xff]  ;;  %v467_v4 = vld [vmem:[#allocation6 + $0x28] sm:$0xff]  ;;  %v465_v7 = vld [vmem:[#allocation6 + $0x18] sm:$0xff]  ;;  %vm37_vm8 = vcmask 7168   ;;  %v528_v23 = vmov -1e+30  }
   0x7   :  { %477 = vset.pattern.permute.xlu1 %v526_v2  ;;  %479 = vset.pattern.permute.xlu0 %v526_v2  ;;  %v197_v5 = vld [vmem:[%s639_s2 + $0x8] sm:$0xff]  ;;  %v466_v6 = vld [vmem:[#allocation6 + $0x20] sm:$0xff]  ;;  %v464_v8 = vld [vmem:[#allocation6 + $0x10] sm:$0xff]  ;;  %v158_v14 = vand.u32 127, %v151_v12  ;;  %v152_v15 = vshrl.u32 %v151_v12, 7  ;;  %38 = vst.msk [vmem:[#allocation2] sm:$0xff] %vm37_vm8, %v528_v23 }
   0x8   :  { %200 = vperm.xlu2 %478, %v196_v3   ;;  %v463_v9 = vld [vmem:[#allocation6 + $0x8] sm:$0xff]  ;;  %v462_v10 = vld [vmem:[#allocation6] sm:$0xff]  ;;  %39 = vst.msk [vmem:[#allocation2 + $0x8] sm:$0xff] %vm37_vm8, %v528_v23 }
   0x9   :  { %v470_v11 = vld [vmem:[%s637_s0] sm:$0xff]  ;;  %vm163_vm0 = vcmp.lt.s32.totalorder %v158_v14, 16  ;;  %vm161_vm1 = vcmp.ne.s32.totalorder %v152_v15, %v158_v14  ;;  %v153_v18 = vadd.s32 8, %v152_v15  ;;  %40 = vst.msk [vmem:[#allocation3] sm:$0xff] %vm37_vm8, %v527_v20 }
   0xa   :  { %122 = vmatpush.bf16.msra.mxu0 %v468_v1  ;;  %vm568_vm2 = vmand %vm163_vm0, %vm161_vm1  ;;  %v480_v17 = vld [vmem:[%s640_s3] ss:$0 sm:$0xff]  ;;  %41 = vst.msk [vmem:[#allocation3 + $0x8] sm:$0xff] %vm37_vm8, %v527_v20 }
   0xb   :  { %vm162_vm4 = vcmp.ne.s32.totalorder %v153_v18, %v158_v14  ;;  %42 = vst.msk [vmem:[#allocation4] sm:$0xff] %vm37_vm8, %v527_v20 }
   0xc   :  { %vm577_vm7 = vmand %vm163_vm0, %vm162_vm4  ;;  %43 = vst.msk [vmem:[#allocation4 + $0x8] sm:$0xff] %vm37_vm8, %v527_v20 }
   0xd   :  { %44 = vst.msk [vmem:[#allocation5] sm:$0xff] %vm37_vm8, %v527_v20 }
   0xe   :  { %123 = vmatpush.bf16.msra.mxu0 %v467_v4  ;;  %45 = vst.msk [vmem:[#allocation5 + $0x8] sm:$0xff] %vm37_vm8, %v527_v20  ;;  %v164_v34 = vld [vmem:[#allocation2] sm:$0xff] }
   0xf   :  { %v165_v38 = vld [vmem:[#allocation2 + $0x8] sm:$0xff] }
  0x10   :  { %203 = vperm.xlu2 %478, %v197_v5   ;;  %v216_v61 = vld [vmem:[#allocation3] sm:$0xff] }
  0x11   :  { %v217_v5 = vld [vmem:[#allocation3 + $0x8] sm:$0xff] }
  0x12   :  { %124 = vmatpush.bf16.msra.mxu0 %v466_v6  ;;  %v247_v14 = vld [vmem:[#allocation4] sm:$0xff] }
  0x14   :  { %v237_v46 = vld [vmem:[#allocation5] sm:$0xff] }
  0x15   :  { %v238_v54 = vld [vmem:[#allocation5 + $0x8] sm:$0xff] }
  0x16   :  { %125 = vmatpush.bf16.msra.mxu0 %v465_v7 }
  0x1a   :  { %126 = vmatpush.bf16.msra.mxu0 %v464_v8 }
  0x1e   :  { %127 = vmatpush.bf16.msra.mxu0 %v463_v9 }
  0x22   :  { %128 = vmatpush.bf16.msra.mxu0 %v462_v10 }
  0x25   :  { %129 = vmatmul.bf16.vlgmr.msra.gmra.mxu0 %v470_v11 }
  0x62   :  { %v201_v13 = vpop.permute.xlu2 %200 }
  0x63   :  { %vm206_vm9 = vcmp.eq.s32.totalorder %v201_v13, %v480_v17 }
  0x64   :  { %vm208_vm10 = vmand %vm206_vm9, %vm161_vm1 }
  0x65   :  { %vm210_vm11 = vmand %vm208_vm10, %vm163_vm0 }
  0x66   :  { %v458_v25 = vsel %vm210_vm11, 1.0, %v527_v20 }
  0x6a   :  { %v204_v19 = vpop.permute.xlu2 %203 }
  0x6b   :  { %vm207_vm3 = vcmp.eq.s32.totalorder %v204_v19, %v480_v17 }
  0x6c   :  { %vm209_vm5 = vmand %vm207_vm3, %vm162_vm4 }
  0x6d   :  { %vm211_vm6 = vmand %vm209_vm5, %vm163_vm0 }
  0x6e   :  { %v459_v21 = vsel %vm211_vm6, 1.0, %v527_v20 }
  0xa2   :  { %v130_v24 = vpop.f32.mrf.mxu0 }
  0xa3   :  { %v135_v26 = vmul.f32 14.285714, %v130_v24 }
  0xa5   :  { %v168_v27 = vsel %vm163_vm0, %v135_v26, -1e+30  ;;  %v178_v28 = vsel %vm568_vm2, %v135_v26, -1e+30  ;;  %v249_v29 = vmul.f32 %v458_v25, %v135_v26 }
  0xa6   :  { %170 = vmax.xlane.f32.xlu0 %v168_v27 }
  0xaa   :  { %v132_v30 = vpop.f32.mrf.mxu0 }
  0xab   :  { %v136_v31 = vmul.f32 14.285714, %v132_v30 }
  0xad   :  { %v169_v32 = vsel %vm163_vm0, %v136_v31, -1e+30  ;;  %v179_v33 = vsel %vm577_vm7, %v136_v31, -1e+30  ;;  %v250_v53 = vmul.f32 %v459_v21, %v136_v31 }
  0xae   :  { %172 = vmax.xlane.f32.xlu0 %v169_v32 }
  0xb6   :  { %239 = vadd.xlane.f32.xlu0 %v458_v25 }
 0x119   :  { %v171_v35 = vpop.xlane.xlu0 %170 }
 0x11a   :  { %v174_v36 = vmax.f32 %v164_v34, %v171_v35 }
 0x11c   :  { %v218_v37 = vsub.f32 %v164_v34, %v174_v36  ;;  %235 = vst.msk [vmem:[#allocation2] sm:$0xff] %vm37_vm8, %v174_v36  ;;  %182 = vperm.xlu1 %477, %v174_v36  }
 0x11e   :  { %v220_v57 = vmul.f32 1.442695, %v218_v37 }
 0x121   :  { %v173_v39 = vpop.xlane.xlu0 %172 }
 0x122   :  { %v175_v40 = vmax.f32 %v165_v38, %v173_v39 }
 0x123   :  { %v348_v22 = vld [vmem:[#allocation2] sm:$0xff] }
 0x124   :  { %v219_v41 = vsub.f32 %v165_v38, %v175_v40  ;;  %236 = vst.msk [vmem:[#allocation2 + $0x8] sm:$0xff] %vm37_vm8, %v175_v40  ;;  %187 = vperm.xlu1 %477, %v175_v40  }
 0x126   :  { %v222_v59 = vmul.f32 1.442695, %v219_v41 }
 0x129   :  { %v240_v45 = vpop.xlane.xlu0 %239 }
 0x12a   :  { %v243_v47 = vadd.f32 %v240_v45, %v237_v46 }
 0x12b   :  { %v349_v40 = vld [vmem:[#allocation2 + $0x8] sm:$0xff] }
 0x12c   :  { %245 = vst.msk [vmem:[#allocation5] sm:$0xff] %vm37_vm8, %v243_v47 }
 0x133   :  { %v601_v58 = vld [vmem:[#allocation5] sm:$0xff] }
 0x134   :  { %vm360_vm12 = vcmp.gt.f32.partialorder %v601_v58, 0.0 }
 0x135   :  { %v362_v62 = vsel %vm360_vm12, %v601_v58, 1.0 }
 0x136   :  { %vm375_vm14 = vweird.f32 %v362_v62  ;;  %v381_v23 = vand.u32 2147483648, %v362_v62  ;;  %v379_v26 = vand.u32 2147483647, %v362_v62 }
 0x138   :  { %v382_v31 = vor.u32 1.1754944e-38, %v381_v23  ;;  %vm380_vm1 = vcmp.eq.f32.partialorder %v379_v26, 8.507059e+37 }
 0x14e   :  { %241 = vadd.xlane.f32.xlu1 %v459_v21 }
 0x18e   :  { %v183_v42 = vpop.permute.xlu1 %182 }
 0x18f   :  { %v190_v43 = vsub.f32 %v178_v28, %v183_v42 }
 0x191   :  { %v192_v44 = vmul.f32 1.442695, %v190_v43 }
 0x193   :  { %481 = vpow2.f32 %v192_v44 }
 0x196   :  { %v188_v48 = vpop.permute.xlu1 %187 }
 0x197   :  { %v191_v49 = vsub.f32 %v179_v33, %v188_v48 }
 0x199   :  { %v482_v50 = vpop.eup %481  ;;  %v194_v51 = vmul.f32 1.442695, %v191_v49 }
 0x19a   :  { %226 = vadd.xlane.f32.xlu2 %v482_v50 }
 0x19b   :  { %483 = vpow2.f32 %v194_v51 }
 0x19c   :  { %485 = vpow2.f32 %v220_v57 }
 0x19d   :  { %487 = vpow2.f32 %v222_v59 }
 0x19e   :  { %489 = vrcp.f32 %v362_v62 }
 0x1a1   :  { %v484_v52 = vpop.eup %483 }
 0x1a2   :  { %228 = vadd.xlane.f32.xlu0 %v484_v52  ;;  %v486_v60 = vpop.eup %485 }
 0x1a3   :  { %v224_v0 = vmul.f32 %v486_v60, %v216_v61  ;;  %v488_v3 = vpop.eup %487 }
 0x1a4   :  { %v490_v6 = vpop.eup %489  ;;  %v225_v7 = vmul.f32 %v488_v3, %v217_v5 }
 0x1a5   :  { %v371_v9 = vmul.f32 %v490_v6, %v362_v62  ;;  %vm376_vm15 = vweird.f32 %v490_v6 }
 0x1a6   :  { %vm616_vm0 = vmor %vm375_vm14, %vm376_vm15 }
 0x1a7   :  { %v372_v13 = vsub.f32 1.0, %v371_v9 }
 0x1a9   :  { %v373_v18 = vmul.f32 %v490_v6, %v372_v13 }
 0x1aa   :  { %251 = vadd.xlane.f32.xlu0 %v249_v29  ;;  %v248_v29 = vld [vmem:[#allocation4 + $0x8] sm:$0xff] }
 0x1ab   :  { %v374_v25 = vadd.f32 %v490_v6, %v373_v18 }
 0x1ad   :  { %v378_v34 = vsel %vm616_vm0, %v490_v6, %v374_v25 }
 0x1ae   :  { %v383_v42 = vsel %vm380_vm1, %v382_v31, %v378_v34 }
 0x1b2   :  { %253 = vadd.xlane.f32.xlu0 %v250_v53 }
 0x1c1   :  { %v242_v55 = vpop.xlane.xlu1 %241 }
 0x1c2   :  { %v244_v56 = vadd.f32 %v242_v55, %v238_v54 }
 0x1c4   :  { %246 = vst.msk [vmem:[#allocation5 + $0x8] sm:$0xff] %vm37_vm8, %v244_v56 }
 0x1cb   :  { %v607_v63 = vld [vmem:[#allocation5 + $0x8] sm:$0xff] }
 0x1cc   :  { %vm361_vm13 = vcmp.gt.f32.partialorder %v607_v63, 0.0 }
 0x1cd   :  { %v363_v4 = vsel %vm361_vm13, %v607_v63, 1.0 }
 0x1ce   :  { %491 = vrcp.f32 %v363_v4  ;;  %vm390_vm2 = vweird.f32 %v363_v4  ;;  %v396_v41 = vand.u32 2147483648, %v363_v4  ;;  %v394_v46 = vand.u32 2147483647, %v363_v4 }
 0x1d0   :  { %v397_v48 = vor.u32 1.1754944e-38, %v396_v41  ;;  %vm395_vm5 = vcmp.eq.f32.partialorder %v394_v46, 8.507059e+37 }
 0x1d4   :  { %v492_v12 = vpop.eup %491 }
 0x1d5   :  { %v386_v15 = vmul.f32 %v492_v12, %v363_v4  ;;  %vm391_vm3 = vweird.f32 %v492_v12 }
 0x1d6   :  { %vm392_vm4 = vmor %vm390_vm2, %vm391_vm3 }
 0x1d7   :  { %v387_v24 = vsub.f32 1.0, %v386_v15 }
 0x1d9   :  { %v388_v30 = vmul.f32 %v492_v12, %v387_v24 }
 0x1db   :  { %v389_v45 = vadd.f32 %v492_v12, %v388_v30 }
 0x1dd   :  { %v393_v51 = vsel %vm392_vm4, %v492_v12, %v389_v45 }
 0x1de   :  { %v398_v54 = vsel %vm395_vm5, %v397_v48, %v393_v51 }
 0x20d   :  { %v227_v1 = vpop.xlane.xlu2 %226 }
 0x20e   :  { %v230_v2 = vadd.f32 %v227_v1, %v224_v0 }
 0x210   :  { %233 = vst.msk [vmem:[#allocation3] sm:$0xff] %vm37_vm8, %v230_v2 }
 0x215   :  { %v229_v8 = vpop.xlane.xlu0 %228 }
 0x216   :  { %v231_v10 = vadd.f32 %v229_v8, %v225_v7 }
 0x217   :  { %v350_v11 = vld [vmem:[#allocation3] sm:$0xff] }
 0x218   :  { %493 = vlog2.f32 %v350_v11  ;;  %234 = vst.msk [vmem:[#allocation3 + $0x8] sm:$0xff] %vm37_vm8, %v231_v10 }
 0x21d   :  { %v252_v16 = vpop.xlane.xlu0 %251 }
 0x21e   :  { %v494_v17 = vpop.eup %493  ;;  %v255_v19 = vadd.f32 %v252_v16, %v247_v14 }
 0x21f   :  { %v353_v20 = vmul.f32 0.6931472, %v494_v17  ;;  %v351_v21 = vld [vmem:[#allocation3 + $0x8] sm:$0xff] }
 0x220   :  { %495 = vlog2.f32 %v351_v21  ;;  %257 = vst.msk [vmem:[#allocation4] sm:$0xff] %vm37_vm8, %v255_v19 }
 0x221   :  { %v356_v27 = vadd.f32 %v353_v20, %v348_v22 }
 0x223   :  { %v366_v35 = vmul.f32 %v601_v58, %v356_v27 }
 0x225   :  { %v254_v32 = vpop.xlane.xlu0 %253 }
 0x226   :  { %v496_v33 = vpop.eup %495  ;;  %v256_v36 = vadd.f32 %v254_v32, %v248_v29 }
 0x227   :  { %v355_v37 = vmul.f32 0.6931472, %v496_v33  ;;  %v364_v38 = vld [vmem:[#allocation4] sm:$0xff] }
 0x228   :  { %v368_v39 = vsub.f32 %v364_v38, %v366_v35  ;;  %258 = vst.msk [vmem:[#allocation4 + $0x8] sm:$0xff] %vm37_vm8, %v256_v36 }
 0x229   :  { %v357_v44 = vadd.f32 %v355_v37, %v349_v40 }
 0x22a   :  { %v384_v43 = vmul.f32 %v383_v42, %v368_v39 }
 0x22b   :  { %v367_v50 = vmul.f32 %v607_v63, %v357_v44 }
 0x22c   :  { %v410_v47 = vmul.f32 -1.0, %v384_v43 }
 0x22e   :  { %v412_v49 = vsel %vm360_vm12, %v410_v47, 0.0 }
 0x22f   :  { %415 = vst.msk [vmem:[%s641_s4] sm:$0xff] %vm37_vm8, %v412_v49  ;;  %v365_v52 = vld [vmem:[#allocation4 + $0x8] sm:$0xff] }
 0x230   :  { %v369_v53 = vsub.f32 %v365_v52, %v367_v50 }
 0x232   :  { %v399_v55 = vmul.f32 %v398_v54, %v369_v53 }
 0x234   :  { %v411_v56 = vmul.f32 -1.0, %v399_v55 }
 0x236   :  { %v413_v57 = vsel %vm361_vm13, %v411_v56, 0.0 }
 0x237   :  { %416 = vst.msk [vmem:[%s641_s4 + $0x8] sm:$0xff] %vm37_vm8, %v413_v57 }
 0x238   :  { %421 = vsyncpa [#allocation7], 1 }

</bundles_post_ra>
